<compile_context>
chip_gen: v6e
topology: v6e:2x2x1
jax: 0.10.0
libtpu: 0.0.40
codegen_flags: <defaults>
</compile_context>

<pallas_src>
import functools

import jax
import jax.numpy as jnp
from jax import lax
from jax.experimental import pallas as pl
from jax.experimental.pallas import tpu as pltpu

_LANES = 128
_SUB_TARGET = 256          # rows per inner accumulation chunk
_SMALL_ROWS = 512          # below this row count use the (cheap) wrapper-pad path
_VMEM_BUDGET = 12 << 20    # total for (n_factors x 2) double-buffered input blocks


def _round_up(x: int, m: int) -> int:
    return ((x + m - 1) // m) * m


def _pick_sub_rows(tile_rows: int, align: int) -> int:
    """Largest multiple of `align` <= _SUB_TARGET that divides tile_rows."""
    s = max(align, (min(_SUB_TARGET, tile_rows) // align) * align)
    while tile_rows % s != 0:
        s -= align
    return s


def _n4_group_kernel(*refs, n_factors, tile_rows, sub_rows, d, n_tiles,
                     steps_per_core, valid_last, weight_scale, g_scale):
    factor_refs = refs[:n_factors]
    g_ref = refs[n_factors]
    o_ref = refs[n_factors + 1]
    acc_ref = refs[n_factors + 2]          # (8, d) f32 — a few vregs only

    c = pl.program_id(0)                   # core (parallel) index
    i = pl.program_id(1)                   # reduction step on this core
    gt = c * steps_per_core + i            # global row-tile index

    @pl.when(i == 0)
    def _init():
        acc_ref[...] = jnp.zeros_like(acc_ref)

    def accumulate(x_ref, valid_rows):
        """acc += (8, d) partial sums of x[:valid_rows, :] ** 3."""
        n_full = valid_rows // sub_rows
        rem = valid_rows - n_full * sub_rows

        def chunk(r0, limit):
            xs = x_ref[pl.ds(r0, sub_rows), :].astype(jnp.float32)
            if limit is not None:          # mask rows beyond the array end
                rows = lax.broadcasted_iota(jnp.int32, (sub_rows, d), 0)
                xs = jnp.where(rows < limit, xs, 0.0)
            cube = xs * xs * xs            # pure VALU
            # Sublane-aligned group reduction: elementwise vreg adds, no XLU.
            acc_ref[...] += jnp.sum(cube.reshape(sub_rows // 8, 8, d), axis=0)

        if n_full == 1:
            chunk(0, None)
        elif n_full > 1:
            def body(j, carry):
                chunk(pl.multiple_of(j * sub_rows, sub_rows), None)
                return carry
            lax.fori_loop(0, n_full, body, 0,
                          unroll=n_full if n_full <= 8 else 8)
        if rem > 0:
            chunk(n_full * sub_rows, rem)

    full_tiles = n_tiles if valid_last == tile_rows else n_tiles - 1

    if full_tiles > 0:
        @pl.when(gt < full_tiles)
        def _full():
            for x_ref in factor_refs:
                accumulate(x_ref, tile_rows)

    if valid_last < tile_rows:
        @pl.when(gt == n_tiles - 1)
        def _ragged():
            for x_ref in factor_refs:
                accumulate(x_ref, valid_last)

    @pl.when(i == pl.num_programs(1) - 1)
    def _epilogue():
        total = jnp.sum(acc_ref[...]) * weight_scale     # single XLU reduce
        if g_scale != 0.0:
            gv = g_ref[...].astype(jnp.float32)
            g_term = jnp.sum(gv * gv) * g_scale
            # Exactly one core contributes the g term (avoid double count).
            total = total + jnp.where(c == 0, g_term, 0.0)
        o_ref[...] = jnp.full(o_ref.shape, total, o_ref.dtype)


def _n4_group_call(group, g2d, *, weight_scale, g_scale):
    """sum_f weight_scale * sum(f**3) over same-shape factors (+ optional g term)."""
    n_f = len(group)
    n_rows, d = group[0].shape
    itemsize = group[0].dtype.itemsize
    row_align = max(8, 32 // itemsize)     # f32 -> 8, bf16 -> 16, int8 -> 32

    small = (n_rows < _SMALL_ROWS and n_rows * d * itemsize <= (4 << 20)) \
        or n_rows < row_align

    if small:
        # Tiny factor: pad rows to the sublane alignment (0**3 == 0), one tile.
        pad_rows = _round_up(n_rows, row_align)
        if pad_rows != n_rows:
            group = tuple(jnp.pad(f, ((0, pad_rows - n_rows), (0, 0)))
                          for f in group)
        tile_rows = pad_rows
        n_tiles = 1
        valid_last = tile_rows
    else:
        # ~2 MiB per input buffer, scaled so n_f x 2 buffers fit every
        # generation's scoped-VMEM default (incl. v5e's 16 MiB).
        block_target = min(4 << 20, max(512 << 10, _VMEM_BUDGET // (2 * n_f)))
        rows_fit = max(row_align, block_target // (d * itemsize))
        max_tile = (n_rows // row_align) * row_align     # never exceed the array
        tile_rows = (min(rows_fit, max_tile) // row_align) * row_align
        if tile_rows >= _SUB_TARGET:
            tile_rows = (tile_rows // _SUB_TARGET) * _SUB_TARGET
        tile_rows = max(tile_rows, row_align)
        n_tiles = pl.cdiv(n_rows, tile_rows)
        valid_last = n_rows - (n_tiles - 1) * tile_rows  # ragged last tile

    sub_rows = _pick_sub_rows(tile_rows, row_align)

    n_cores = 2 if n_tiles > 1 else 1                    # v7x: split across TCs
    steps = pl.cdiv(n_tiles, n_cores)
    grid = (n_cores, steps)
    last_tile = n_tiles - 1

    def fmap(c, i):
        # Clamp the (possibly uneven) core split to a valid tile; the kernel
        # skips the compute for clamped steps via pl.when.
        return (jnp.minimum(c * steps + i, last_tile), 0)

    kernel = functools.partial(
        _n4_group_kernel,
        n_factors=n_f, tile_rows=tile_rows, sub_rows=sub_rows, d=d,
        n_tiles=n_tiles, steps_per_core=steps, valid_last=valid_last,
        weight_scale=float(weight_scale), g_scale=float(g_scale))

    out = pl.pallas_call(
        kernel,
        out_shape=jax.ShapeDtypeStruct((n_cores, 8, _LANES), jnp.float32),
        grid_spec=pltpu.PrefetchScalarGridSpec(
            num_scalar_prefetch=0,
            grid=grid,
            in_specs=[pl.BlockSpec((tile_rows, d), fmap) for _ in range(n_f)]
                     + [pl.BlockSpec(g2d.shape, lambda c, i: (0, 0))],
            out_specs=pl.BlockSpec((1, 8, _LANES), lambda c, i: (c, 0, 0)),
            scratch_shapes=[pltpu.VMEM((8, d), jnp.float32)],
        ),
        compiler_params=pltpu.CompilerParams(
            dimension_semantics=("parallel", "arbitrary")),
    )(*group, g2d)
    return jnp.sum(out[:, 0, 0])


def n4_forward(factors, g=None, *, weight: float, g_weight: float = 0.02):
    """JAX/Pallas equivalent of N4.forward(factors, g)."""
    if g is None:
        g = jnp.zeros((1,), dtype=jnp.float32)

    batch = factors[0].shape[0]
    weight_scale = float(weight) / float(batch)

    # Canonicalize factors to 2-D [rows, d] views (KGE factors already are).
    fs2 = []
    for f in factors:
        if f.ndim == 2:
            fs2.append(f)
        elif f.ndim == 1:
            fs2.append(f.reshape(1, -1))
        else:
            fs2.append(f.reshape(-1, f.shape[-1]))

    # Group same-shape/dtype factors into a single fused pallas_call each
    # (the common KGE case — lhs/rel/rhs embeddings — is one call total).
    groups = {}
    for f in fs2:
        groups.setdefault((f.shape, f.dtype), []).append(f)

    # g is tiny: zero-pad it into one resident lane-dense block (0**2 == 0).
    g_flat = jnp.ravel(g).astype(jnp.float32)
    g_len = int(g_flat.shape[0])
    g_rows = max(8, _round_up(pl.cdiv(g_len, _LANES), 8))
    g2d = jnp.pad(g_flat, (0, g_rows * _LANES - g_len)).reshape(g_rows, _LANES)

    total = None
    first = True
    for (_, _), group in groups.items():
        part = _n4_group_call(
            tuple(group), g2d,
            weight_scale=weight_scale,
            g_scale=float(g_weight) if first else 0.0)   # g added exactly once
        total = part if total is None else total + part
        first = False
    return total


def _reference(factors, g, weight, g_weight):
    ref = jnp.float32(0.0)
    for f in factors:
        ref = ref + weight * jnp.sum(f.astype(jnp.float32) ** 3)
    ref = ref / factors[0].shape[0]
    ref = ref + g_weight * jnp.sum(g.astype(jnp.float32) ** 2)
    return ref


if __name__ == "__main__":
    key = jax.random.PRNGKey(0)
    k1, k2, k3, kg, k4, k5, k6 = jax.random.split(key, 7)

    weight, g_weight = 0.1, 0.02

    # --- small case: three [batch=16, rank=32] factors + tiny g ------------
    factors = (
        jax.random.normal(k1, (16, 32), dtype=jnp.float32),
        jax.random.normal(k2, (16, 32), dtype=jnp.float32),
        jax.random.normal(k3, (16, 32), dtype=jnp.float32),
    )
    g = jax.random.normal(kg, (8,), dtype=jnp.float32)

    out = jax.block_until_ready(n4_forward(factors, g, weight=weight,
                                           g_weight=g_weight))
    ref = _reference(factors, g, weight, g_weight)
    assert jnp.allclose(out, ref, rtol=1e-5, atol=1e-5), (out, ref)

    # --- larger case exercising the tiled / dual-core / ragged path --------
    factors_big = (
        jax.random.normal(k4, (640, 256), dtype=jnp.float32),
        jax.random.normal(k5, (640, 256), dtype=jnp.float32),
        jax.random.normal(k6, (640, 256), dtype=jnp.float32),
    )
    out_big = jax.block_until_ready(n4_forward(factors_big, g, weight=weight,
                                               g_weight=g_weight))
    ref_big = _reference(factors_big, g, weight, g_weight)
    assert jnp.allclose(out_big, ref_big, rtol=1e-2, atol=1e-2), (out_big, ref_big)

    print("KERNEL_OK")
</pallas_src>

<mosaic_0001>
module attributes {stable_mosaic.version = 11 : i64} {
  func.func @_n4_group_kernel(%arg0: i32, %arg1: i32, %arg2: memref<16x32xf32, #tpu.memory_space<vmem>>, %arg3: memref<16x32xf32, #tpu.memory_space<vmem>>, %arg4: memref<16x32xf32, #tpu.memory_space<vmem>>, %arg5: memref<8x128xf32, #tpu.memory_space<vmem>>, %arg6: memref<1x8x128xf32, #tpu.memory_space<vmem>>, %arg7: memref<8x32xf32, #tpu.memory_space<vmem>>) attributes {dimension_semantics = [#tpu.dimension_semantics<parallel>, #tpu.dimension_semantics<arbitrary>], iteration_bounds = array<i64: 1, 1>, scalar_prefetch = 0 : i64, scratch_operands = 1 : i64, tpu.core_type = #tpu.core_type<tc>, window_params = [{transform_indices = @transform_0, window_bounds = array<i64: 16, 32>}, {transform_indices = @transform_1, window_bounds = array<i64: 16, 32>}, {transform_indices = @transform_2, window_bounds = array<i64: 16, 32>}, {pipeline_mode = #tpu.pipeline_mode<synchronous>, transform_indices = @transform_3, window_bounds = array<i64: 8, 128>}, {transform_indices = @transform_4, window_bounds = array<i64: 1, 8, 128>}]} {
    %c1_i32 = arith.constant 1 : i32
    %0 = arith.muli %arg0, %c1_i32 : i32
    %1 = arith.addi %0, %arg1 : i32
    %c0_i32 = arith.constant 0 : i32
    %2 = arith.cmpi eq, %arg1, %c0_i32 : i32
    %3 = arith.extui %2 : i1 to i32
    %c0_i32_0 = arith.constant 0 : i32
    %4 = arith.cmpi ne, %3, %c0_i32_0 : i32
    scf.if %4 {
      %cst = arith.constant 0.000000e+00 : f32
      %11 = vector.broadcast %cst : f32 to vector<8x32xf32>
      %c0 = arith.constant 0 : index
      %c0_5 = arith.constant 0 : index
      %12 = vector.load %arg7[%c0, %c0_5] : memref<8x32xf32, #tpu.memory_space<vmem>>, vector<8x32xf32>
      tpu.vector_store %arg7[%c0, %c0_5], %11 {strides = array<i32>} : memref<8x32xf32, #tpu.memory_space<vmem>>, vector<8x32xf32>,
    } else {
    }
    %c1_i32_1 = arith.constant 1 : i32
    %5 = arith.cmpi slt, %1, %c1_i32_1 : i32
    %6 = arith.extui %5 : i1 to i32
    %c0_i32_2 = arith.constant 0 : i32
    %7 = arith.cmpi ne, %6, %c0_i32_2 : i32
    scf.if %7 {
      %c0 = arith.constant 0 : index
      %c0_5 = arith.constant 0 : index
      %11 = vector.load %arg2[%c0, %c0_5] : memref<16x32xf32, #tpu.memory_space<vmem>>, vector<16x32xf32>
      %12 = arith.mulf %11, %11 : vector<16x32xf32>
      %13 = arith.mulf %12, %11 : vector<16x32xf32>
      %c0_6 = arith.constant 0 : index
      %c0_7 = arith.constant 0 : index
      %14 = vector.load %arg7[%c0_6, %c0_7] : memref<8x32xf32, #tpu.memory_space<vmem>>, vector<8x32xf32>
      %15 = vector.shape_cast %13 : vector<16x32xf32> to vector<2x8x32xf32>
      %cst = arith.constant dense<0.000000e+00> : vector<8x32xf32>
      %16 = vector.multi_reduction <add>, %15, %cst [0] : vector<2x8x32xf32> to vector<8x32xf32>
      %17 = arith.addf %14, %16 : vector<8x32xf32>
      %c0_8 = arith.constant 0 : index
      %c0_9 = arith.constant 0 : index
      %18 = vector.load %arg7[%c0_8, %c0_9] : memref<8x32xf32, #tpu.memory_space<vmem>>, vector<8x32xf32>
      tpu.vector_store %arg7[%c0_8, %c0_9], %17 {strides = array<i32>} : memref<8x32xf32, #tpu.memory_space<vmem>>, vector<8x32xf32>,
      %c0_10 = arith.constant 0 : index
      %c0_11 = arith.constant 0 : index
      %19 = vector.load %arg3[%c0_10, %c0_11] : memref<16x32xf32, #tpu.memory_space<vmem>>, vector<16x32xf32>
      %20 = arith.mulf %19, %19 : vector<16x32xf32>
      %21 = arith.mulf %20, %19 : vector<16x32xf32>
      %c0_12 = arith.constant 0 : index
      %c0_13 = arith.constant 0 : index
      %22 = vector.load %arg7[%c0_12, %c0_13] : memref<8x32xf32, #tpu.memory_space<vmem>>, vector<8x32xf32>
      %23 = vector.shape_cast %21 : vector<16x32xf32> to vector<2x8x32xf32>
      %cst_14 = arith.constant dense<0.000000e+00> : vector<8x32xf32>
      %24 = vector.multi_reduction <add>, %23, %cst_14 [0] : vector<2x8x32xf32> to vector<8x32xf32>
      %25 = arith.addf %22, %24 : vector<8x32xf32>
      %c0_15 = arith.constant 0 : index
      %c0_16 = arith.constant 0 : index
      %26 = vector.load %arg7[%c0_15, %c0_16] : memref<8x32xf32, #tpu.memory_space<vmem>>, vector<8x32xf32>
      tpu.vector_store %arg7[%c0_15, %c0_16], %25 {strides = array<i32>} : memref<8x32xf32, #tpu.memory_space<vmem>>, vector<8x32xf32>,
      %c0_17 = arith.constant 0 : index
      %c0_18 = arith.constant 0 : index
      %27 = vector.load %arg4[%c0_17, %c0_18] : memref<16x32xf32, #tpu.memory_space<vmem>>, vector<16x32xf32>
      %28 = arith.mulf %27, %27 : vector<16x32xf32>
      %29 = arith.mulf %28, %27 : vector<16x32xf32>
      %c0_19 = arith.constant 0 : index
      %c0_20 = arith.constant 0 : index
      %30 = vector.load %arg7[%c0_19, %c0_20] : memref<8x32xf32, #tpu.memory_space<vmem>>, vector<8x32xf32>
      %31 = vector.shape_cast %29 : vector<16x32xf32> to vector<2x8x32xf32>
      %cst_21 = arith.constant dense<0.000000e+00> : vector<8x32xf32>
      %32 = vector.multi_reduction <add>, %31, %cst_21 [0] : vector<2x8x32xf32> to vector<8x32xf32>
      %33 = arith.addf %30, %32 : vector<8x32xf32>
      %c0_22 = arith.constant 0 : index
      %c0_23 = arith.constant 0 : index
      %34 = vector.load %arg7[%c0_22, %c0_23] : memref<8x32xf32, #tpu.memory_space<vmem>>, vector<8x32xf32>
      tpu.vector_store %arg7[%c0_22, %c0_23], %33 {strides = array<i32>} : memref<8x32xf32, #tpu.memory_space<vmem>>, vector<8x32xf32>,
    } else {
    }
    %c0_i32_3 = arith.constant 0 : i32
    %8 = arith.cmpi eq, %arg1, %c0_i32_3 : i32
    %9 = arith.extui %8 : i1 to i32
    %c0_i32_4 = arith.constant 0 : i32
    %10 = arith.cmpi ne, %9, %c0_i32_4 : i32
    scf.if %10 {
      %c0 = arith.constant 0 : index
      %c0_5 = arith.constant 0 : index
      %11 = vector.load %arg7[%c0, %c0_5] : memref<8x32xf32, #tpu.memory_space<vmem>>, vector<8x32xf32>
      %12 = vector.shape_cast %11 : vector<8x32xf32> to vector<1x8x32xf32>
      %cst = arith.constant dense<0.000000e+00> : vector<1xf32>
      %13 = vector.multi_reduction <add>, %12, %cst [1, 2] : vector<1x8x32xf32> to vector<1xf32>
      %14 = vector.shape_cast %13 : vector<1xf32> to vector<1x1x1xf32>
      %15 = vector.extract %14[0, 0, 0] : f32 from vector<1x1x1xf32>
      %cst_6 = arith.constant 6.250000e-03 : f32
      %16 = arith.mulf %15, %cst_6 : f32
      %c0_7 = arith.constant 0 : index
      %c0_8 = arith.constant 0 : index
      %17 = vector.load %arg5[%c0_7, %c0_8] : memref<8x128xf32, #tpu.memory_space<vmem>>, vector<8x128xf32>
      %18 = arith.mulf %17, %17 : vector<8x128xf32>
      %19 = vector.shape_cast %18 : vector<8x128xf32> to vector<1x8x128xf32>
      %cst_9 = arith.constant dense<0.000000e+00> : vector<1xf32>
      %20 = vector.multi_reduction <add>, %19, %cst_9 [1, 2] : vector<1x8x128xf32> to vector<1xf32>
      %21 = vector.shape_cast %20 : vector<1xf32> to vector<1x1x1xf32>
      %22 = vector.extract %21[0, 0, 0] : f32 from vector<1x1x1xf32>
      %cst_10 = arith.constant 2.000000e-02 : f32
      %23 = arith.mulf %22, %cst_10 : f32
      %c0_i32_11 = arith.constant 0 : i32
      %24 = arith.cmpi eq, %arg0, %c0_i32_11 : i32
      %cst_12 = arith.constant 0.000000e+00 : f32
      %25 = arith.select %24, %23, %cst_12 : f32
      %26 = arith.addf %16, %25 : f32
      %27 = vector.broadcast %26 : f32 to vector<1x8x128xf32>
      %c0_13 = arith.constant 0 : index
      %c0_14 = arith.constant 0 : index
      %c0_15 = arith.constant 0 : index
      %28 = vector.load %arg6[%c0_13, %c0_14, %c0_15] : memref<1x8x128xf32, #tpu.memory_space<vmem>>, vector<1x8x128xf32>
      tpu.vector_store %arg6[%c0_13, %c0_14, %c0_15], %27 {strides = array<i32>} : memref<1x8x128xf32, #tpu.memory_space<vmem>>, vector<1x8x128xf32>,
    } else {
    }
    return
  }
  func.func @transform_0(%arg0: i32, %arg1: i32) -> (i32, i32) {
    %c1_i32 = arith.constant 1 : i32
    %0 = arith.muli %arg0, %c1_i32 : i32
    %1 = arith.addi %0, %arg1 : i32
    %c0_i32 = arith.constant 0 : i32
    %2 = arith.minsi %1, %c0_i32 : i32
    %c0_i32_0 = arith.constant 0 : i32
    %c0_i32_1 = arith.constant 0 : i32
    return %2, %c0_i32_0 : i32, i32
  }
  func.func @transform_1(%arg0: i32, %arg1: i32) -> (i32, i32) {
    %c1_i32 = arith.constant 1 : i32
    %0 = arith.muli %arg0, %c1_i32 : i32
    %1 = arith.addi %0, %arg1 : i32
    %c0_i32 = arith.constant 0 : i32
    %2 = arith.minsi %1, %c0_i32 : i32
    %c0_i32_0 = arith.constant 0 : i32
    %c0_i32_1 = arith.constant 0 : i32
    return %2, %c0_i32_0 : i32, i32
  }
  func.func @transform_2(%arg0: i32, %arg1: i32) -> (i32, i32) {
    %c1_i32 = arith.constant 1 : i32
    %0 = arith.muli %arg0, %c1_i32 : i32
    %1 = arith.addi %0, %arg1 : i32
    %c0_i32 = arith.constant 0 : i32
    %2 = arith.minsi %1, %c0_i32 : i32
    %c0_i32_0 = arith.constant 0 : i32
    %c0_i32_1 = arith.constant 0 : i32
    return %2, %c0_i32_0 : i32, i32
  }
  func.func @transform_3(%arg0: i32, %arg1: i32) -> (i32, i32) {
    %c0_i32 = arith.constant 0 : i32
    %c0_i32_0 = arith.constant 0 : i32
    %c0_i32_1 = arith.constant 0 : i32
    return %c0_i32, %c0_i32_0 : i32, i32
  }
  func.func @transform_4(%arg0: i32, %arg1: i32) -> (i32, i32, i32) {
    %c0_i32 = arith.constant 0 : i32
    %c0_i32_0 = arith.constant 0 : i32
    %c0_i32_1 = arith.constant 0 : i32
    return %arg0, %c0_i32, %c0_i32_0 : i32, i32, i32
  }
}

</mosaic_0001>

<bundles_post_ra>
// kernel: tpu_custom_call.1
= control target key start
LH: loop header
LB: loop body
LE: loop exit
PB: predicated region body
PF: predicated region fallthrough
CT: control target
= control target key end

     0   :  { %9 = vsyncpa [#allocation4], 0  ;;  %s384_s0 = inlined_call_operand.hbm [shape: f32[16,32], index: 0, kind: input, shape index: {}]   ;;  %s385_s1 = inlined_call_operand.hbm [shape: f32[16,32], index: 1, kind: input, shape index: {}]   ;;  %s386_s2 = inlined_call_operand.hbm [shape: f32[16,32], index: 2, kind: input, shape index: {}]   ;;  %s387_s3 = inlined_call_operand.hbm [shape: f32[8,128], index: 3, kind: input, shape index: {}]   ;;  %s388_s4 = inlined_call_operand.hbm [shape: f32[1,8,128], index: 4, kind: output, shape index: {}]  }
   0x1   :  { %10 = vsyncpa [#allocation7], 0 }
   0x2   :  { %11 = vsyncpa [#allocation10], 0 }
   0x3   :  { %12 = vsyncpa [#allocation5], 0  ;;  %s325_s15 = smov [#allocation6]   ;;  %s326_s17 = smov [#allocation3]  }
   0x4   :  { %s42_s16 = sshll.u32 %s325_s15, 4  ;;  %s24_s18 = sshll.u32 %s326_s17, 4  ;;  %s43_s16 = int_to_ptr.vmem [resolvable:$true] %s42_s16  ;;  %s25_s18 = int_to_ptr.vmem [resolvable:$true] %s24_s18 }
   0x5   :  { %s225_s19 = scalar_lea.vmem %s43_s16, 256  ;;  %p230_p1 = scmp.lt.s32.totalorder %s43_s16, %s43_s16 }
   0x6   :  { %p226_p0 = scmp.ne.s32.totalorder %s43_s16, %s225_s19  ;;  %p231_p2 = scmp.lt.s32.totalorder %s225_s19, %s225_s19 }
   0x8   :  { %p232_p3 = por %p231_p2, %p230_p1 }
   0xa   :  { %p233_p4 = pnand %p232_p3, %p226_p0 }
   0xc   :  { %236 = shalt.err (!%p233_p4)
}
   0xd   :  { %s327_s20 = smov 128   ;;  %s328_s21 = smov 8  }
   0xe   :  { %48 = dma.hbm_to_vmem [thread:$0]  %s385_s1, 256, %s43_s16, [#allocation7], %s327_s20, %s327_s20, %s328_s21  }
   0xf   :  { %s245_s24 = scalar_lea.vmem %s25_s18, 256  ;;  %p250_p6 = scmp.lt.s32.totalorder %s25_s18, %s25_s18 }
  0x10   :  { %p246_p5 = scmp.ne.s32.totalorder %s25_s18, %s245_s24  ;;  %p251_p7 = scmp.lt.s32.totalorder %s245_s24, %s245_s24 }
  0x12   :  { %p252_p8 = por %p251_p7, %p250_p6 }
  0x14   :  { %p253_p9 = pnand %p252_p8, %p246_p5 }
  0x16   :  { %256 = shalt.err (!%p253_p9)
}
  0x17   :  { %30 = dma.hbm_to_vmem [thread:$0]  %s384_s0, 256, %s25_s18, [#allocation4], %s327_s20, %s327_s20, %s328_s21  }
  0x18   :  { %s329_s27 = smov [#allocation8]   ;;  %s330_s29 = smov [#allocation9]  }
  0x19   :  { %s60_s28 = sshll.u32 %s329_s27, 4  ;;  %s73_s30 = sshll.u32 %s330_s29, 4  ;;  %s61_s28 = int_to_ptr.vmem [resolvable:$true] %s60_s28  ;;  %s74_s30 = int_to_ptr.vmem [resolvable:$true] %s73_s30 }
  0x1a   :  { %s265_s5 = scalar_lea.vmem %s61_s28, 256  ;;  %p270_p11 = scmp.lt.s32.totalorder %s61_s28, %s61_s28 }
  0x1b   :  { %p266_p10 = scmp.ne.s32.totalorder %s61_s28, %s265_s5  ;;  %p271_p12 = scmp.lt.s32.totalorder %s265_s5, %s265_s5 }
  0x1d   :  { %p272_p13 = por %p271_p12, %p270_p11 }
  0x1f   :  { %p273_p0 = pnand %p272_p13, %p266_p10 }
  0x21   :  { %276 = shalt.err (!%p273_p0)
}
  0x22   :  { %66 = dma.hbm_to_vmem [thread:$0]  %s386_s2, 256, %s61_s28, [#allocation7], %s327_s20, %s327_s20, %s328_s21  }
  0x23   :  { %s285_s7 = scalar_lea.vmem %s74_s30, 128  ;;  %p290_p2 = scmp.lt.s32.totalorder %s74_s30, %s74_s30 }
  0x24   :  { %p286_p1 = scmp.ne.s32.totalorder %s74_s30, %s285_s7  ;;  %p291_p3 = scmp.lt.s32.totalorder %s285_s7, %s285_s7 }
  0x26   :  { %p292_p4 = por %p291_p3, %p290_p2 }
  0x28   :  { %p293_p5 = pnand %p292_p4, %p286_p1 }
  0x2a   :  { %296 = shalt.err (!%p293_p5)
}
  0x2b   :  { %76 = dma.hbm_to_vmem [thread:$0]  %s387_s3, 128, %s74_s30, [#allocation10]  }
  0x2c   :  { %317 = dma.done.wait [#allocation4], 256  }
  0x2d   :  { %318 = vsyncadd [#allocation4], 4294967040 }
  0x2e   :  { %319 = dma.done.wait [#allocation7], 512  }
  0x2f   :  { %320 = vsyncadd [#allocation7], 4294966784 }
  0x30   :  { %321 = dma.done.wait [#allocation10], 128  }
  0x31   :  { %322 = vsyncadd [#allocation10], 4294967168  ;;  %vm106_vm0 = vcmask 261120   ;;  %v331_v0 = vmov 0.0   ;;  %v112_v1 = vld [vmem:[#allocation3] sm:$0xff]  ;;  %v113_v2 = vld [vmem:[#allocation3 + $0x8] sm:$0xff] }
  0x32   :  { %107 = vst.msk [vmem:[#allocation2] sm:$0xff] %vm106_vm0, %v331_v0  ;;  %v125_v3 = vld [vmem:[#allocation6] sm:$0xff]  ;;  %v114_v4 = vmul.f32 %v112_v1, %v112_v1  ;;  %v115_v5 = vmul.f32 %v113_v2, %v113_v2  ;;  %v126_v6 = vld [vmem:[#allocation6 + $0x8] sm:$0xff]  ;;  %v137_v18 = vld [vmem:[#allocation8] sm:$0xff]  ;;  %s332_s11 = smov [#allocation11]  }
  0x33   :  { %v127_v9 = vmul.f32 %v125_v3, %v125_v3  ;;  %v128_v10 = vmul.f32 %v126_v6, %v126_v6  ;;  %v138_v19 = vld [vmem:[#allocation8 + $0x8] sm:$0xff]  ;;  %v139_v22 = vmul.f32 %v137_v18, %v137_v18  ;;  %v165_v34 = vld [vmem:[#allocation9] sm:$0xff]  ;;  %s188_s12 = sshll.u32 %s332_s11, 4  ;;  %s189_s12 = int_to_ptr.vmem [resolvable:$true] %s188_s12 }
  0x34   :  { %v116_v7 = vmul.f32 %v114_v4, %v112_v1  ;;  %v117_v8 = vmul.f32 %v115_v5, %v113_v2  ;;  %v140_v23 = vmul.f32 %v138_v19, %v138_v19  ;;  %v166_v37 = vmul.f32 %v165_v34, %v165_v34  ;;  %s297_s14 = scalar_lea.vmem %s189_s12, 128  ;;  %p302_p7 = scmp.lt.s32.totalorder %s189_s12, %s189_s12 }
  0x35   :  { %v129_v15 = vmul.f32 %v127_v9, %v125_v3  ;;  %v130_v16 = vmul.f32 %v128_v10, %v126_v6  ;;  %v141_v26 = vmul.f32 %v139_v22, %v137_v18  ;;  %p298_p6 = scmp.ne.s32.totalorder %s189_s12, %s297_s14  ;;  %p303_p8 = scmp.lt.s32.totalorder %s297_s14, %s297_s14 }
  0x36   :  { %v120_v12 = vsel %vm106_vm0, %v116_v7, 0.0  ;;  %v121_v13 = vsel %vm106_vm0, %v117_v8, 0.0  ;;  %v142_v27 = vmul.f32 %v140_v23, %v138_v19 }
  0x37   :  { %v122_v14 = vadd.f32 %v121_v13, %v120_v12  ;;  %v132_v20 = vsel %vm106_vm0, %v129_v15, 0.0  ;;  %v133_v21 = vsel %vm106_vm0, %v130_v16, 0.0  ;;  %v144_v29 = vsel %vm106_vm0, %v141_v26, 0.0  ;;  %p304_p9 = por %p303_p8, %p302_p7 }
  0x38   :  { %v134_v24 = vadd.f32 %v133_v21, %v132_v20  ;;  %v145_v30 = vsel %vm106_vm0, %v142_v27, 0.0 }
  0x39   :  { %v118_v11 = vld [vmem:[#allocation2] sm:$0xff]  ;;  %v146_v31 = vadd.f32 %v145_v30, %v144_v29  ;;  %p305_p10 = pnand %p304_p9, %p298_p6 }
  0x3a   :  { %v123_v17 = vadd.f32 %v122_v14, %v118_v11 }
  0x3c   :  { %124 = vst.msk [vmem:[#allocation2] sm:$0xff] %vm106_vm0, %v123_v17 }
  0x43   :  { %v131_v25 = vld [vmem:[#allocation2] sm:$0xff] }
  0x44   :  { %v135_v28 = vadd.f32 %v134_v24, %v131_v25 }
  0x46   :  { %136 = vst.msk [vmem:[#allocation2] sm:$0xff] %vm106_vm0, %v135_v28 }
  0x4d   :  { %v143_v32 = vld [vmem:[#allocation2] sm:$0xff] }
  0x4e   :  { %v147_v33 = vadd.f32 %v146_v31, %v143_v32 }
  0x50   :  { %148 = vst.msk [vmem:[#allocation2] sm:$0xff] %vm106_vm0, %v147_v33 }
  0x57   :  { %v152_v35 = vld [vmem:[#allocation2] sm:$0xff] }
  0x58   :  { %v154_v36 = vsel %vm106_vm0, %v152_v35, 0.0 }
  0x59   :  { %155 = vadd.xlane.f32.xlu0 %v154_v36 }
  0x5d   :  { %167 = vadd.xlane.f32.xlu0 %v166_v37 }
  0xe2   :  { %v156_v38 = vpop.xlane.xlu0 %155 }
  0xe3   :  { %v157_v39 = vrot.slane %v156_v38, 4 }
  0xe5   :  { %v158_v40 = vadd.f32 %v157_v39, %v156_v38 }
  0xe6   :  { %v168_v41 = vpop.xlane.xlu0 %167 }
  0xe7   :  { %v159_v42 = vrot.slane %v158_v40, 2  ;;  %v169_v43 = vrot.slane %v168_v41, 4 }
  0xe9   :  { %v170_v44 = vadd.f32 %v169_v43, %v168_v41  ;;  %v160_v45 = vadd.f32 %v159_v42, %v158_v40 }
  0xeb   :  { %v171_v46 = vrot.slane %v170_v44, 2  ;;  %v161_v47 = vrot.slane %v160_v45, 1 }
  0xed   :  { %v172_v48 = vadd.f32 %v171_v46, %v170_v44  ;;  %v162_v49 = vadd.f32 %v161_v47, %v160_v45 }
  0xef   :  { %205 = vpush %v162_v49  ;;  %v173_v50 = vrot.slane %v172_v48, 1 }
  0xf1   :  { %v174_v51 = vadd.f32 %v173_v50, %v172_v48 }
  0xf3   :  { %207 = vpush %v174_v51 }
 0x120   :  { %s206_s2 = spop %205 }
 0x121   :  { %s164_s3 = smul.f32 0.00625, %s206_s2 }
 0x124   :  { %s208_s9 = spop %207 }
 0x125   :  { %s176_s10 = smul.f32 0.02, %s208_s9 }
 0x127   :  { %s179_s13 = sadd.f32 %s176_s10, %s164_s3 }
 0x129   :  { %v180_v52 = vstv %s179_s13 }
 0x12a   :  { %181 = vst [vmem:[#allocation11] sm:$0xff] %v180_v52 }
 0x12b   :  { %308 = shalt.err (!%p305_p10)
}
 0x12c   :  { %191 = dma.vmem_to_hbm [thread:$0]  %s189_s12, 128, %s388_s4, [#allocation5]  }
 0x12d   :  { %323 = dma.done.wait [#allocation5], 128  }
 0x12e   :  { %324 = vsyncadd [#allocation5], 4294967168 }
 0x12f   :  { %195 = vsyncpa [#allocation4], 1 }
 0x130   :  { %196 = vsyncpa [#allocation7], 1 }
 0x131   :  { %197 = vsyncpa [#allocation10], 1 }
 0x132   :  { %198 = vsyncpa [#allocation5], 1 }

</bundles_post_ra>
